<compile_context>
chip_gen: v6e
topology: v6e:2x2x1
jax: 0.10.0
libtpu: 0.0.40
codegen_flags: <defaults>
</compile_context>

<pallas_src>
import numpy as np
import jax
import jax.numpy as jnp
from jax.experimental import pallas as pl
from jax.experimental.pallas import tpu as pltpu

LANE = 128


def _pair(v):
    return (v, v) if isinstance(v, int) else tuple(v)


def subtraction_pallas(x, kernel_size, stride, padding, dilation, pad_mode):
    """Pallas implementation of the SAN `Subtraction` forward pass."""
    kernel_size, stride, padding, dilation = (
        _pair(kernel_size), _pair(stride), _pair(padding), _pair(dilation))
    N, C, H, W = x.shape
    KH, KW = kernel_size
    sH, sW = stride
    pH, pW = padding
    dH, dW = dilation
    oH = (H + 2 * pH - (dH * (KH - 1) + 1)) // sH + 1
    oW = (W + 2 * pW - (dW * (KW - 1) + 1)) // sW + 1
    khc, kwc = (KH - 1) // 2, (KW - 1) // 2
    Hp, Wp = H + 2 * pH, W + 2 * pW
    NC = N * C
    NCp = ((NC + LANE - 1) // LANE) * LANE  # pad channels to a lane multiple

    # --- JAX glue: channel-last relayout + spatial padding -------------------
    mode = "reflect" if pad_mode == 1 else "constant"
    xt = jnp.transpose(x.reshape(NC, H, W), (1, 2, 0))           # (H, W, NC)
    xt = jnp.pad(xt, ((pH, pH), (pW, pW), (0, 0)), mode=mode)    # (Hp, Wp, NC)
    if NCp > NC:
        xt = jnp.pad(xt, ((0, 0), (0, 0), (0, NCp - NC)))        # zero channels
    # TODO(synk): pad+transpose costs one extra input-sized HBM round trip
    # (~10% of total traffic); could be folded into the kernel with in-kernel
    # border masking for pad_mode=0.

    itemsize = jnp.dtype(x.dtype).itemsize
    in_per_chan = Hp * Wp * itemsize
    out_per_chan = KH * KW * oH * oW * itemsize

    # Channel block: largest of {512, 384, 256, 128} dividing NCp whose
    # double-buffered input+output blocks stay well inside v7x's 64 MiB VMEM.
    budget = 20 * 1024 * 1024
    cb = 128
    for cand in (512, 384, 256, 128):
        if NCp % cand == 0 and 2 * cand * (in_per_chan + out_per_chan) <= budget:
            cb = cand
            break

    vmem_need = 2 * cb * (in_per_chan + out_per_chan) + (2 << 20)
    vmem_limit = int(min(max(vmem_need, 32 * 1024 * 1024), 48 * 1024 * 1024))

    def window(ref, h0, w0):
        # (oH, oW, cb) strided spatial window; plain slices in the stride-1 case.
        if sH == 1 and sW == 1:
            return ref[h0:h0 + oH, w0:w0 + oW, :]
        return ref[pl.ds(h0, oH, sH), pl.ds(w0, oW, sW), :]

    def kernel(xp_ref, out_ref):
        # xp_ref : (Hp, Wp, cb)        padded planes, channel-minor (lane-dense)
        # out_ref: (KH*KW, oH, oW, cb) one tile per kernel offset
        for kh in range(KH):
            for kw in range(KW):
                k = kh * KW + kw
                if kh == khc and kw == kwc:
                    # center - center == 0: skip the redundant subtract.
                    out_ref[k] = jnp.zeros((oH, oW, cb), dtype=out_ref.dtype)
                else:
                    ctr = window(xp_ref, khc * dH, kwc * dW)
                    nb = window(xp_ref, kh * dH, kw * dW)
                    out_ref[k] = (ctr - nb).astype(out_ref.dtype)

    out = pl.pallas_call(
        kernel,
        out_shape=jax.ShapeDtypeStruct((KH * KW, oH, oW, NCp), x.dtype),
        grid=(NCp // cb,),
        in_specs=[pl.BlockSpec((Hp, Wp, cb), lambda i: (0, 0, i))],
        out_specs=pl.BlockSpec((KH * KW, oH, oW, cb), lambda i: (0, 0, 0, i)),
        compiler_params=pltpu.CompilerParams(
            dimension_semantics=("parallel",),
            vmem_limit_bytes=vmem_limit),
    )(xt)

    # Back to the module's (N, C, KH*KW, oH*oW) layout.
    out = out[..., :NC]                                # (K, oH, oW, NC)
    out = jnp.transpose(out, (3, 0, 1, 2))             # (NC, K, oH, oW)
    return out.reshape(N, C, KH * KW, oH * oW)


def subtraction_reference(x, kernel_size, stride, padding, dilation, pad_mode):
    """Direct (slow) numpy port of the CUDA kernels, for verification."""
    kernel_size, stride, padding, dilation = (
        _pair(kernel_size), _pair(stride), _pair(padding), _pair(dilation))
    x = np.asarray(x)
    N, C, H, W = x.shape
    KH, KW = kernel_size
    sH, sW = stride
    pH, pW = padding
    dH, dW = dilation
    oH = (H + 2 * pH - (dH * (KH - 1) + 1)) // sH + 1
    oW = (W + 2 * pW - (dW * (KW - 1) + 1)) // sW + 1
    out = np.zeros((N, C, KH * KW, oH * oW), dtype=x.dtype)
    for n in range(N):
        for c in range(C):
            for h in range(oH):
                for w in range(oW):
                    hc = -pH + h * sH + ((KH - 1) // 2) * dH
                    wc = -pW + w * sW + ((KW - 1) // 2) * dW
                    center = x[n, c, hc, wc]
                    for kh in range(KH):
                        for kw in range(KW):
                            hi = -pH + h * sH + kh * dH
                            wi = -pW + w * sW + kw * dW
                            if 0 <= hi < H and 0 <= wi < W:
                                v = x[n, c, hi, wi]
                            elif pad_mode == 1:  # reflect
                                if hi < 0:
                                    hi = -hi
                                if hi >= H:
                                    hi = 2 * (H - 1) - hi
                                if wi < 0:
                                    wi = -wi
                                if wi >= W:
                                    wi = 2 * (W - 1) - wi
                                v = x[n, c, hi, wi]
                            else:  # zero pad
                                v = 0.0
                            out[n, c, kh * KW + kw, h * oW + w] = center - v
    return out


if __name__ == "__main__":
    # Module config: Subtraction(kernel_size=3, stride=1, padding=1, dilation=1, pad_mode)
    kernel_size, stride, padding, dilation = 3, 1, 1, 1

    key = jax.random.PRNGKey(0)
    x = jax.random.normal(key, (2, 4, 16, 16), dtype=jnp.float32)

    ok = True
    for pad_mode in (0, 1):  # 0: zero pad, 1: reflection pad
        out = subtraction_pallas(x, kernel_size, stride, padding, dilation, pad_mode)
        out = jax.block_until_ready(out)
        ref = subtraction_reference(np.asarray(x), kernel_size, stride, padding,
                                    dilation, pad_mode)
        if out.shape != ref.shape or not np.allclose(np.asarray(out), ref,
                                                     atol=1e-5, rtol=1e-5):
            ok = False

    if ok:
        print("KERNEL_OK")
    else:
        print("KERNEL_MISMATCH")
</pallas_src>

<mosaic_0001>
module attributes {stable_mosaic.version = 11 : i64} {
  func.func @kernel(%arg0: i32, %arg1: memref<18x18x128xf32, #tpu.memory_space<vmem>>, %arg2: memref<9x16x16x128xf32, #tpu.memory_space<vmem>>) attributes {dimension_semantics = [#tpu.dimension_semantics<parallel>], iteration_bounds = array<i64: 1>, scalar_prefetch = 0 : i64, scratch_operands = 0 : i64, tpu.core_type = #tpu.core_type<tc>, window_params = [{transform_indices = @transform_0, window_bounds = array<i64: 18, 18, 128>}, {transform_indices = @transform_1, window_bounds = array<i64: 9, 16, 16, 128>}]} {
    %c1 = arith.constant 1 : index
    %c1_0 = arith.constant 1 : index
    %c0 = arith.constant 0 : index
    %0 = vector.load %arg1[%c1, %c1_0, %c0] : memref<18x18x128xf32, #tpu.memory_space<vmem>>, vector<16x16x128xf32>
    %c0_1 = arith.constant 0 : index
    %c0_2 = arith.constant 0 : index
    %c0_3 = arith.constant 0 : index
    %1 = vector.load %arg1[%c0_1, %c0_2, %c0_3] : memref<18x18x128xf32, #tpu.memory_space<vmem>>, vector<16x16x128xf32>
    %2 = arith.subf %0, %1 : vector<16x16x128xf32>
    %c0_4 = arith.constant 0 : index
    %c0_5 = arith.constant 0 : index
    %c0_6 = arith.constant 0 : index
    %c0_7 = arith.constant 0 : index
    %3 = vector.load %arg2[%c0_4, %c0_5, %c0_6, %c0_7] : memref<9x16x16x128xf32, #tpu.memory_space<vmem>>, vector<1x16x16x128xf32>
    %4 = vector.shape_cast %3 : vector<1x16x16x128xf32> to vector<16x16x128xf32>
    %5 = vector.shape_cast %2 : vector<16x16x128xf32> to vector<1x16x16x128xf32>
    tpu.vector_store %arg2[%c0_4, %c0_5, %c0_6, %c0_7], %5 {strides = array<i32>} : memref<9x16x16x128xf32, #tpu.memory_space<vmem>>, vector<1x16x16x128xf32>,
    %c1_8 = arith.constant 1 : index
    %c1_9 = arith.constant 1 : index
    %c0_10 = arith.constant 0 : index
    %6 = vector.load %arg1[%c1_8, %c1_9, %c0_10] : memref<18x18x128xf32, #tpu.memory_space<vmem>>, vector<16x16x128xf32>
    %c0_11 = arith.constant 0 : index
    %c1_12 = arith.constant 1 : index
    %c0_13 = arith.constant 0 : index
    %7 = vector.load %arg1[%c0_11, %c1_12, %c0_13] : memref<18x18x128xf32, #tpu.memory_space<vmem>>, vector<16x16x128xf32>
    %8 = arith.subf %6, %7 : vector<16x16x128xf32>
    %c1_14 = arith.constant 1 : index
    %c0_15 = arith.constant 0 : index
    %c0_16 = arith.constant 0 : index
    %c0_17 = arith.constant 0 : index
    %9 = vector.load %arg2[%c1_14, %c0_15, %c0_16, %c0_17] : memref<9x16x16x128xf32, #tpu.memory_space<vmem>>, vector<1x16x16x128xf32>
    %10 = vector.shape_cast %9 : vector<1x16x16x128xf32> to vector<16x16x128xf32>
    %11 = vector.shape_cast %8 : vector<16x16x128xf32> to vector<1x16x16x128xf32>
    tpu.vector_store %arg2[%c1_14, %c0_15, %c0_16, %c0_17], %11 {strides = array<i32>} : memref<9x16x16x128xf32, #tpu.memory_space<vmem>>, vector<1x16x16x128xf32>,
    %c1_18 = arith.constant 1 : index
    %c1_19 = arith.constant 1 : index
    %c0_20 = arith.constant 0 : index
    %12 = vector.load %arg1[%c1_18, %c1_19, %c0_20] : memref<18x18x128xf32, #tpu.memory_space<vmem>>, vector<16x16x128xf32>
    %c0_21 = arith.constant 0 : index
    %c2 = arith.constant 2 : index
    %c0_22 = arith.constant 0 : index
    %13 = vector.load %arg1[%c0_21, %c2, %c0_22] : memref<18x18x128xf32, #tpu.memory_space<vmem>>, vector<16x16x128xf32>
    %14 = arith.subf %12, %13 : vector<16x16x128xf32>
    %c2_23 = arith.constant 2 : index
    %c0_24 = arith.constant 0 : index
    %c0_25 = arith.constant 0 : index
    %c0_26 = arith.constant 0 : index
    %15 = vector.load %arg2[%c2_23, %c0_24, %c0_25, %c0_26] : memref<9x16x16x128xf32, #tpu.memory_space<vmem>>, vector<1x16x16x128xf32>
    %16 = vector.shape_cast %15 : vector<1x16x16x128xf32> to vector<16x16x128xf32>
    %17 = vector.shape_cast %14 : vector<16x16x128xf32> to vector<1x16x16x128xf32>
    tpu.vector_store %arg2[%c2_23, %c0_24, %c0_25, %c0_26], %17 {strides = array<i32>} : memref<9x16x16x128xf32, #tpu.memory_space<vmem>>, vector<1x16x16x128xf32>,
    %c1_27 = arith.constant 1 : index
    %c1_28 = arith.constant 1 : index
    %c0_29 = arith.constant 0 : index
    %18 = vector.load %arg1[%c1_27, %c1_28, %c0_29] : memref<18x18x128xf32, #tpu.memory_space<vmem>>, vector<16x16x128xf32>
    %c1_30 = arith.constant 1 : index
    %c0_31 = arith.constant 0 : index
    %c0_32 = arith.constant 0 : index
    %19 = vector.load %arg1[%c1_30, %c0_31, %c0_32] : memref<18x18x128xf32, #tpu.memory_space<vmem>>, vector<16x16x128xf32>
    %20 = arith.subf %18, %19 : vector<16x16x128xf32>
    %c3 = arith.constant 3 : index
    %c0_33 = arith.constant 0 : index
    %c0_34 = arith.constant 0 : index
    %c0_35 = arith.constant 0 : index
    %21 = vector.load %arg2[%c3, %c0_33, %c0_34, %c0_35] : memref<9x16x16x128xf32, #tpu.memory_space<vmem>>, vector<1x16x16x128xf32>
    %22 = vector.shape_cast %21 : vector<1x16x16x128xf32> to vector<16x16x128xf32>
    %23 = vector.shape_cast %20 : vector<16x16x128xf32> to vector<1x16x16x128xf32>
    tpu.vector_store %arg2[%c3, %c0_33, %c0_34, %c0_35], %23 {strides = array<i32>} : memref<9x16x16x128xf32, #tpu.memory_space<vmem>>, vector<1x16x16x128xf32>,
    %cst = arith.constant 0.000000e+00 : f32
    %24 = vector.broadcast %cst : f32 to vector<16x16x128xf32>
    %c4 = arith.constant 4 : index
    %c0_36 = arith.constant 0 : index
    %c0_37 = arith.constant 0 : index
    %c0_38 = arith.constant 0 : index
    %25 = vector.load %arg2[%c4, %c0_36, %c0_37, %c0_38] : memref<9x16x16x128xf32, #tpu.memory_space<vmem>>, vector<1x16x16x128xf32>
    %26 = vector.shape_cast %25 : vector<1x16x16x128xf32> to vector<16x16x128xf32>
    %27 = vector.shape_cast %24 : vector<16x16x128xf32> to vector<1x16x16x128xf32>
    tpu.vector_store %arg2[%c4, %c0_36, %c0_37, %c0_38], %27 {strides = array<i32>} : memref<9x16x16x128xf32, #tpu.memory_space<vmem>>, vector<1x16x16x128xf32>,
    %c1_39 = arith.constant 1 : index
    %c1_40 = arith.constant 1 : index
    %c0_41 = arith.constant 0 : index
    %28 = vector.load %arg1[%c1_39, %c1_40, %c0_41] : memref<18x18x128xf32, #tpu.memory_space<vmem>>, vector<16x16x128xf32>
    %c1_42 = arith.constant 1 : index
    %c2_43 = arith.constant 2 : index
    %c0_44 = arith.constant 0 : index
    %29 = vector.load %arg1[%c1_42, %c2_43, %c0_44] : memref<18x18x128xf32, #tpu.memory_space<vmem>>, vector<16x16x128xf32>
    %30 = arith.subf %28, %29 : vector<16x16x128xf32>
    %c5 = arith.constant 5 : index
    %c0_45 = arith.constant 0 : index
    %c0_46 = arith.constant 0 : index
    %c0_47 = arith.constant 0 : index
    %31 = vector.load %arg2[%c5, %c0_45, %c0_46, %c0_47] : memref<9x16x16x128xf32, #tpu.memory_space<vmem>>, vector<1x16x16x128xf32>
    %32 = vector.shape_cast %31 : vector<1x16x16x128xf32> to vector<16x16x128xf32>
    %33 = vector.shape_cast %30 : vector<16x16x128xf32> to vector<1x16x16x128xf32>
    tpu.vector_store %arg2[%c5, %c0_45, %c0_46, %c0_47], %33 {strides = array<i32>} : memref<9x16x16x128xf32, #tpu.memory_space<vmem>>, vector<1x16x16x128xf32>,
    %c1_48 = arith.constant 1 : index
    %c1_49 = arith.constant 1 : index
    %c0_50 = arith.constant 0 : index
    %34 = vector.load %arg1[%c1_48, %c1_49, %c0_50] : memref<18x18x128xf32, #tpu.memory_space<vmem>>, vector<16x16x128xf32>
    %c2_51 = arith.constant 2 : index
    %c0_52 = arith.constant 0 : index
    %c0_53 = arith.constant 0 : index
    %35 = vector.load %arg1[%c2_51, %c0_52, %c0_53] : memref<18x18x128xf32, #tpu.memory_space<vmem>>, vector<16x16x128xf32>
    %36 = arith.subf %34, %35 : vector<16x16x128xf32>
    %c6 = arith.constant 6 : index
    %c0_54 = arith.constant 0 : index
    %c0_55 = arith.constant 0 : index
    %c0_56 = arith.constant 0 : index
    %37 = vector.load %arg2[%c6, %c0_54, %c0_55, %c0_56] : memref<9x16x16x128xf32, #tpu.memory_space<vmem>>, vector<1x16x16x128xf32>
    %38 = vector.shape_cast %37 : vector<1x16x16x128xf32> to vector<16x16x128xf32>
    %39 = vector.shape_cast %36 : vector<16x16x128xf32> to vector<1x16x16x128xf32>
    tpu.vector_store %arg2[%c6, %c0_54, %c0_55, %c0_56], %39 {strides = array<i32>} : memref<9x16x16x128xf32, #tpu.memory_space<vmem>>, vector<1x16x16x128xf32>,
    %c1_57 = arith.constant 1 : index
    %c1_58 = arith.constant 1 : index
    %c0_59 = arith.constant 0 : index
    %40 = vector.load %arg1[%c1_57, %c1_58, %c0_59] : memref<18x18x128xf32, #tpu.memory_space<vmem>>, vector<16x16x128xf32>
    %c2_60 = arith.constant 2 : index
    %c1_61 = arith.constant 1 : index
    %c0_62 = arith.constant 0 : index
    %41 = vector.load %arg1[%c2_60, %c1_61, %c0_62] : memref<18x18x128xf32, #tpu.memory_space<vmem>>, vector<16x16x128xf32>
    %42 = arith.subf %40, %41 : vector<16x16x128xf32>
    %c7 = arith.constant 7 : index
    %c0_63 = arith.constant 0 : index
    %c0_64 = arith.constant 0 : index
    %c0_65 = arith.constant 0 : index
    %43 = vector.load %arg2[%c7, %c0_63, %c0_64, %c0_65] : memref<9x16x16x128xf32, #tpu.memory_space<vmem>>, vector<1x16x16x128xf32>
    %44 = vector.shape_cast %43 : vector<1x16x16x128xf32> to vector<16x16x128xf32>
    %45 = vector.shape_cast %42 : vector<16x16x128xf32> to vector<1x16x16x128xf32>
    tpu.vector_store %arg2[%c7, %c0_63, %c0_64, %c0_65], %45 {strides = array<i32>} : memref<9x16x16x128xf32, #tpu.memory_space<vmem>>, vector<1x16x16x128xf32>,
    %c1_66 = arith.constant 1 : index
    %c1_67 = arith.constant 1 : index
    %c0_68 = arith.constant 0 : index
    %46 = vector.load %arg1[%c1_66, %c1_67, %c0_68] : memref<18x18x128xf32, #tpu.memory_space<vmem>>, vector<16x16x128xf32>
    %c2_69 = arith.constant 2 : index
    %c2_70 = arith.constant 2 : index
    %c0_71 = arith.constant 0 : index
    %47 = vector.load %arg1[%c2_69, %c2_70, %c0_71] : memref<18x18x128xf32, #tpu.memory_space<vmem>>, vector<16x16x128xf32>
    %48 = arith.subf %46, %47 : vector<16x16x128xf32>
    %c8 = arith.constant 8 : index
    %c0_72 = arith.constant 0 : index
    %c0_73 = arith.constant 0 : index
    %c0_74 = arith.constant 0 : index
    %49 = vector.load %arg2[%c8, %c0_72, %c0_73, %c0_74] : memref<9x16x16x128xf32, #tpu.memory_space<vmem>>, vector<1x16x16x128xf32>
    %50 = vector.shape_cast %49 : vector<1x16x16x128xf32> to vector<16x16x128xf32>
    %51 = vector.shape_cast %48 : vector<16x16x128xf32> to vector<1x16x16x128xf32>
    tpu.vector_store %arg2[%c8, %c0_72, %c0_73, %c0_74], %51 {strides = array<i32>} : memref<9x16x16x128xf32, #tpu.memory_space<vmem>>, vector<1x16x16x128xf32>,
    return
  }
  func.func @transform_0(%arg0: i32) -> (i32, i32, i32) {
    %c0_i32 = arith.constant 0 : i32
    %c0_i32_0 = arith.constant 0 : i32
    %c0_i32_1 = arith.constant 0 : i32
    return %c0_i32, %c0_i32_0, %arg0 : i32, i32, i32
  }
  func.func @transform_1(%arg0: i32) -> (i32, i32, i32, i32) {
    %c0_i32 = arith.constant 0 : i32
    %c0_i32_0 = arith.constant 0 : i32
    %c0_i32_1 = arith.constant 0 : i32
    %c0_i32_2 = arith.constant 0 : i32
    return %c0_i32, %c0_i32_0, %c0_i32_1, %arg0 : i32, i32, i32, i32
  }
}

</mosaic_0001>

<bundles_post_ra>
// kernel: tpu_custom_call.1
= control target key start
LH: loop header
LB: loop body
LE: loop exit
PB: predicated region body
PF: predicated region fallthrough
CT: control target
= control target key end

     0   :  { %6 = vsyncpa [#allocation3], 0  ;;  %s1846_s0 = inlined_call_operand.hbm [shape: f32[18,18,128], index: 0, kind: input, shape index: {}]   ;;  %s1847_s1 = inlined_call_operand.hbm [shape: f32[9,16,16,128], index: 1, kind: output, shape index: {}]  }
   0x1   :  { %7 = vsyncpa [#allocation4], 0  ;;  %s1155_s6 = smov [#allocation2]  }
   0x2   :  { %s13_s7 = sshll.u32 %s1155_s6, 4  ;;  %s14_s7 = int_to_ptr.vmem [resolvable:$true] %s13_s7 }
   0x3   :  { %s1119_s8 = scalar_lea.vmem %s14_s7, 6912  ;;  %p1124_p1 = scmp.lt.s32.totalorder %s14_s7, %s14_s7 }
   0x4   :  { %p1120_p0 = scmp.ne.s32.totalorder %s14_s7, %s1119_s8  ;;  %p1125_p2 = scmp.lt.s32.totalorder %s1119_s8, %s1119_s8 }
   0x6   :  { %p1126_p3 = por %p1125_p2, %p1124_p1 }
   0x8   :  { %p1127_p4 = pnand %p1126_p3, %p1120_p0 }
   0xa   :  { %1130 = shalt.err (!%p1127_p4)
}
   0xb   :  { %s1156_s9 = smov 128   ;;  %s1157_s10 = smov 8  }
   0xc   :  { %19 = dma.hbm_to_vmem [thread:$0]  %s1846_s0, 6912, %s14_s7, [#allocation3], %s1156_s9, %s1156_s9, %s1157_s10  }
   0xd   :  { %1151 = dma.done.wait [#allocation3], 6912  }
   0xe   :  { %1152 = vsyncadd [#allocation3], 4294960384  ;;  %v1158_v0 = vmov 0.0   ;;  %v1176_v1 = vld [vmem:[#allocation2 + $0x19] sm:$0xff]  ;;  %v1178_v3 = vld [vmem:[#allocation2 + $0x21] sm:$0xff]  ;;  %s1159_s0 = smov [#allocation5]  }
   0xf   :  { %540 = vst [vmem:[#allocation5 + $0x400] sm:$0xff] %v1158_v0  ;;  %541 = vst [vmem:[#allocation5 + $0x408] sm:$0xff] %v1158_v0  ;;  %v56_v2 = vld [vmem:[#allocation2] sm:$0xff]  ;;  %v57_v5 = vld [vmem:[#allocation2 + $0x8] sm:$0xff]  ;;  %s1094_s13 = sshll.u32 %s1159_s0, 4  ;;  %s1095_s13 = int_to_ptr.vmem [resolvable:$true] %s1094_s13 }
  0x10   :  { %542 = vst [vmem:[#allocation5 + $0x410] sm:$0xff] %v1158_v0  ;;  %543 = vst [vmem:[#allocation5 + $0x418] sm:$0xff] %v1158_v0  ;;  %v88_v4 = vsub.f32 %v1176_v1, %v56_v2  ;;  %v1181_v6 = vld [vmem:[#allocation2 + $0x31] sm:$0xff]  ;;  %v89_v8 = vsub.f32 %v1178_v3, %v57_v5  ;;  %v1185_v10 = vld [vmem:[#allocation2 + $0x39] sm:$0xff]  ;;  %s1131_s14 = scalar_lea.vmem %s1095_s13, 36864  ;;  %p1136_p6 = scmp.lt.s32.totalorder %s1095_s13, %s1095_s13 }
  0x11   :  { %544 = vst [vmem:[#allocation5 + $0x420] sm:$0xff] %v1158_v0  ;;  %545 = vst [vmem:[#allocation5 + $0x428] sm:$0xff] %v1158_v0  ;;  %v58_v7 = vld [vmem:[#allocation2 + $0x18] sm:$0xff]  ;;  %v59_v11 = vld [vmem:[#allocation2 + $0x20] sm:$0xff]  ;;  %v218_v13 = vsub.f32 %v1181_v6, %v1176_v1  ;;  %v219_v19 = vsub.f32 %v1185_v10, %v1178_v3  ;;  %p1132_p5 = scmp.ne.s32.totalorder %s1095_s13, %s1131_s14  ;;  %p1137_p7 = scmp.lt.s32.totalorder %s1131_s14, %s1131_s14 }
  0x12   :  { %546 = vst [vmem:[#allocation5 + $0x430] sm:$0xff] %v1158_v0  ;;  %547 = vst [vmem:[#allocation5 + $0x438] sm:$0xff] %v1158_v0  ;;  %v90_v9 = vsub.f32 %v1181_v6, %v58_v7  ;;  %v1187_v12 = vld [vmem:[#allocation2 + $0x49] sm:$0xff]  ;;  %v474_v14 = vsub.f32 %v1176_v1, %v58_v7  ;;  %v91_v15 = vsub.f32 %v1185_v10, %v59_v11  ;;  %v1193_v17 = vld [vmem:[#allocation2 + $0x51] sm:$0xff] }
  0x13   :  { %548 = vst [vmem:[#allocation5 + $0x440] sm:$0xff] %v1158_v0  ;;  %549 = vst [vmem:[#allocation5 + $0x448] sm:$0xff] %v1158_v0  ;;  %v60_v16 = vld [vmem:[#allocation2 + $0x30] sm:$0xff]  ;;  %v61_v18 = vld [vmem:[#allocation2 + $0x38] sm:$0xff]  ;;  %v220_v20 = vsub.f32 %v1187_v12, %v1181_v6  ;;  %v475_v21 = vsub.f32 %v1178_v3, %v59_v11  ;;  %v221_v27 = vsub.f32 %v1193_v17, %v1185_v10  ;;  %p1138_p8 = por %p1137_p7, %p1136_p6 }
  0x14   :  { %550 = vst [vmem:[#allocation5 + $0x450] sm:$0xff] %v1158_v0  ;;  %551 = vst [vmem:[#allocation5 + $0x458] sm:$0xff] %v1158_v0  ;;  %v92_v22 = vsub.f32 %v1187_v12, %v60_v16  ;;  %v93_v23 = vsub.f32 %v1193_v17, %v61_v18  ;;  %v1202_v24 = vld [vmem:[#allocation2 + $0x61] sm:$0xff]  ;;  %v1204_v26 = vld [vmem:[#allocation2 + $0x69] sm:$0xff]  ;;  %v476_v28 = vsub.f32 %v1181_v6, %v60_v16 }
  0x15   :  { %552 = vst [vmem:[#allocation5 + $0x460] sm:$0xff] %v1158_v0  ;;  %553 = vst [vmem:[#allocation5 + $0x468] sm:$0xff] %v1158_v0  ;;  %v62_v25 = vld [vmem:[#allocation2 + $0x48] sm:$0xff]  ;;  %v63_v30 = vld [vmem:[#allocation2 + $0x50] sm:$0xff]  ;;  %v222_v33 = vsub.f32 %v1202_v24, %v1187_v12  ;;  %v223_v34 = vsub.f32 %v1204_v26, %v1193_v17  ;;  %v477_v35 = vsub.f32 %v1185_v10, %v61_v18  ;;  %p1139_p9 = pnand %p1138_p8, %p1132_p5 }
  0x16   :  { %554 = vst [vmem:[#allocation5 + $0x470] sm:$0xff] %v1158_v0  ;;  %555 = vst [vmem:[#allocation5 + $0x478] sm:$0xff] %v1158_v0  ;;  %v94_v29 = vsub.f32 %v1202_v24, %v62_v25  ;;  %v1210_v31 = vld [vmem:[#allocation2 + $0x79] sm:$0xff]  ;;  %v95_v36 = vsub.f32 %v1204_v26, %v63_v30  ;;  %v1219_v38 = vld [vmem:[#allocation2 + $0x81] sm:$0xff]  ;;  %v478_v42 = vsub.f32 %v1187_v12, %v62_v25 }
  0x17   :  { %556 = vst [vmem:[#allocation5 + $0x480] sm:$0xff] %v1158_v0  ;;  %557 = vst [vmem:[#allocation5 + $0x488] sm:$0xff] %v1158_v0  ;;  %v64_v32 = vld [vmem:[#allocation2 + $0x60] sm:$0xff]  ;;  %v65_v39 = vld [vmem:[#allocation2 + $0x68] sm:$0xff]  ;;  %v224_v41 = vsub.f32 %v1210_v31, %v1202_v24  ;;  %v225_v47 = vsub.f32 %v1219_v38, %v1204_v26  ;;  %v479_v49 = vsub.f32 %v1193_v17, %v63_v30 }
  0x18   :  { %558 = vst [vmem:[#allocation5 + $0x490] sm:$0xff] %v1158_v0  ;;  %559 = vst [vmem:[#allocation5 + $0x498] sm:$0xff] %v1158_v0  ;;  %v96_v37 = vsub.f32 %v1210_v31, %v64_v32  ;;  %v1221_v40 = vld [vmem:[#allocation2 + $0x91] sm:$0xff]  ;;  %v97_v43 = vsub.f32 %v1219_v38, %v65_v39  ;;  %v1227_v45 = vld [vmem:[#allocation2 + $0x99] sm:$0xff]  ;;  %v480_v56 = vsub.f32 %v1202_v24, %v64_v32 }
  0x19   :  { %560 = vst [vmem:[#allocation5 + $0x4a0] sm:$0xff] %v1158_v0  ;;  %561 = vst [vmem:[#allocation5 + $0x4a8] sm:$0xff] %v1158_v0  ;;  %v66_v44 = vld [vmem:[#allocation2 + $0x78] sm:$0xff]  ;;  %v1229_v46 = vld [vmem:[#allocation2 + $0x80] sm:$0xff]  ;;  %v226_v48 = vsub.f32 %v1221_v40, %v1210_v31  ;;  %v227_v55 = vsub.f32 %v1227_v45, %v1219_v38  ;;  %v481_v63 = vsub.f32 %v1204_v26, %v65_v39 }
  0x1a   :  { %562 = vst [vmem:[#allocation5 + $0x4b0] sm:$0xff] %v1158_v0  ;;  %563 = vst [vmem:[#allocation5 + $0x4b8] sm:$0xff] %v1158_v0  ;;  %v98_v50 = vsub.f32 %v1221_v40, %v66_v44  ;;  %v99_v51 = vsub.f32 %v1227_v45, %v1229_v46  ;;  %v1239_v52 = vld [vmem:[#allocation2 + $0xa9] sm:$0xff]  ;;  %v1243_v54 = vld [vmem:[#allocation2 + $0xb1] sm:$0xff] }
  0x1b   :  { %564 = vst [vmem:[#allocation5 + $0x4c0] sm:$0xff] %v1158_v0  ;;  %565 = vst [vmem:[#allocation5 + $0x4c8] sm:$0xff] %v1158_v0  ;;  %v1241_v53 = vld [vmem:[#allocation2 + $0x90] sm:$0xff]  ;;  %v1250_v58 = vld [vmem:[#allocation2 + $0x98] sm:$0xff]  ;;  %v228_v61 = vsub.f32 %v1239_v52, %v1221_v40  ;;  %v229_v62 = vsub.f32 %v1243_v54, %v1227_v45 }
  0x1c   :  { %566 = vst [vmem:[#allocation5 + $0x4d0] sm:$0xff] %v1158_v0  ;;  %567 = vst [vmem:[#allocation5 + $0x4d8] sm:$0xff] %v1158_v0  ;;  %v100_v57 = vsub.f32 %v1239_v52, %v1241_v53  ;;  %v1252_v59 = vld [vmem:[#allocation2 + $0xc1] sm:$0xff]  ;;  %v1267_v5 = vld [vmem:[#allocation2 + $0xb0] sm:$0xff] }
  0x1d   :  { %568 = vst [vmem:[#allocation5 + $0x4e0] sm:$0xff] %v1158_v0  ;;  %569 = vst [vmem:[#allocation5 + $0x4e8] sm:$0xff] %v1158_v0  ;;  %v1254_v60 = vld [vmem:[#allocation2 + $0xa8] sm:$0xff]  ;;  %v1269_v7 = vld [vmem:[#allocation2 + $0xd9] sm:$0xff] }
  0x1e   :  { %570 = vst [vmem:[#allocation5 + $0x4f0] sm:$0xff] %v1158_v0  ;;  %571 = vst [vmem:[#allocation5 + $0x4f8] sm:$0xff] %v1158_v0  ;;  %v101_v0 = vsub.f32 %v1243_v54, %v1250_v58  ;;  %v102_v2 = vsub.f32 %v1252_v59, %v1254_v60  ;;  %v232_v18 = vsub.f32 %v1269_v7, %v1252_v59  ;;  %v1296_v25 = vld [vmem:[#allocation2 + $0xf9] sm:$0xff]  ;;  %v1306_v32 = vld [vmem:[#allocation2 + $0x109] sm:$0xff] }
  0x1f   :  { %120 = vst [vmem:[#allocation5] sm:$0xff] %v88_v4  ;;  %121 = vst [vmem:[#allocation5 + $0x8] sm:$0xff] %v89_v8  ;;  %v1265_v4 = vld [vmem:[#allocation2 + $0xc9] sm:$0xff]  ;;  %v230_v8 = vsub.f32 %v1252_v59, %v1239_v52  ;;  %v1304_v30 = vld [vmem:[#allocation2 + $0xe0] sm:$0xff] }
  0x20   :  { %122 = vst [vmem:[#allocation5 + $0x10] sm:$0xff] %v90_v9  ;;  %251 = vst [vmem:[#allocation5 + $0x110] sm:$0xff] %v218_v13  ;;  %v482_v9 = vsub.f32 %v1210_v31, %v66_v44  ;;  %v103_v11 = vsub.f32 %v1265_v4, %v1267_v5  ;;  %v1276_v13 = vld [vmem:[#allocation2 + $0xc0] sm:$0xff]  ;;  %v231_v16 = vsub.f32 %v1265_v4, %v1243_v54 }
  0x21   :  { %507 = vst [vmem:[#allocation5 + $0x300] sm:$0xff] %v474_v14  ;;  %123 = vst [vmem:[#allocation5 + $0x18] sm:$0xff] %v91_v15  ;;  %v1278_v14 = vld [vmem:[#allocation2 + $0xe1] sm:$0xff] }
  0x22   :  { %252 = vst [vmem:[#allocation5 + $0x118] sm:$0xff] %v219_v19  ;;  %253 = vst [vmem:[#allocation5 + $0x120] sm:$0xff] %v220_v20  ;;  %v1280_v15 = vld [vmem:[#allocation2 + $0xc8] sm:$0xff]  ;;  %v483_v19 = vsub.f32 %v1219_v38, %v1229_v46  ;;  %v104_v20 = vsub.f32 %v1269_v7, %v1276_v13  ;;  %v486_v46 = vsub.f32 %v1239_v52, %v1254_v60  ;;  %v1350_v60 = vld [vmem:[#allocation2 + $0x120] sm:$0xff] }
  0x23   :  { %508 = vst [vmem:[#allocation5 + $0x308] sm:$0xff] %v475_v21  ;;  %124 = vst [vmem:[#allocation5 + $0x20] sm:$0xff] %v92_v22  ;;  %v105_v21 = vsub.f32 %v1278_v14, %v1280_v15  ;;  %v1292_v22 = vld [vmem:[#allocation2 + $0xf1] sm:$0xff] }
  0x24   :  { %125 = vst [vmem:[#allocation5 + $0x28] sm:$0xff] %v93_v23  ;;  %254 = vst [vmem:[#allocation5 + $0x128] sm:$0xff] %v221_v27  ;;  %v1294_v23 = vld [vmem:[#allocation2 + $0xd8] sm:$0xff]  ;;  %v233_v27 = vsub.f32 %v1278_v14, %v1265_v4  ;;  %v236_v44 = vsub.f32 %v1306_v32, %v1292_v22 }
  0x25   :  { %509 = vst [vmem:[#allocation5 + $0x310] sm:$0xff] %v476_v28  ;;  %126 = vst [vmem:[#allocation5 + $0x30] sm:$0xff] %v94_v29  ;;  %v484_v28 = vsub.f32 %v1221_v40, %v1241_v53  ;;  %v106_v29 = vsub.f32 %v1292_v22, %v1294_v23 }
  0x26   :  { %255 = vst [vmem:[#allocation5 + $0x130] sm:$0xff] %v222_v33  ;;  %256 = vst [vmem:[#allocation5 + $0x138] sm:$0xff] %v223_v34  ;;  %v1308_v33 = vld [vmem:[#allocation2 + $0xf0] sm:$0xff]  ;;  %v234_v34 = vsub.f32 %v1292_v22, %v1269_v7 }
  0x27   :  { %510 = vst [vmem:[#allocation5 + $0x318] sm:$0xff] %v477_v35  ;;  %127 = vst [vmem:[#allocation5 + $0x38] sm:$0xff] %v95_v36  ;;  %v235_v35 = vsub.f32 %v1296_v25, %v1278_v14  ;;  %v485_v36 = vsub.f32 %v1227_v45, %v1250_v58  ;;  %v108_v39 = vsub.f32 %v1306_v32, %v1308_v33  ;;  %v1348_v58 = vld [vmem:[#allocation2 + $0x139] sm:$0xff] }
  0x28   :  { %128 = vst [vmem:[#allocation5 + $0x40] sm:$0xff] %v96_v37  ;;  %257 = vst [vmem:[#allocation5 + $0x140] sm:$0xff] %v224_v41  ;;  %v107_v37 = vsub.f32 %v1296_v25, %v1304_v30  ;;  %v1320_v41 = vld [vmem:[#allocation2 + $0x111] sm:$0xff] }
  0x29   :  { %511 = vst [vmem:[#allocation5 + $0x320] sm:$0xff] %v478_v42  ;;  %129 = vst [vmem:[#allocation5 + $0x48] sm:$0xff] %v97_v43  ;;  %v1322_v42 = vld [vmem:[#allocation2 + $0xf8] sm:$0xff]  ;;  %v1324_v43 = vld [vmem:[#allocation2 + $0x121] sm:$0xff] }
  0x2a   :  { %258 = vst [vmem:[#allocation5 + $0x148] sm:$0xff] %v225_v47  ;;  %259 = vst [vmem:[#allocation5 + $0x150] sm:$0xff] %v226_v48  ;;  %v109_v47 = vsub.f32 %v1320_v41, %v1322_v42  ;;  %v1332_v48 = vld [vmem:[#allocation2 + $0x108] sm:$0xff]  ;;  %v238_v53 = vsub.f32 %v1324_v43, %v1306_v32 }
  0x2b   :  { %512 = vst [vmem:[#allocation5 + $0x328] sm:$0xff] %v479_v49  ;;  %130 = vst [vmem:[#allocation5 + $0x50] sm:$0xff] %v98_v50  ;;  %v1334_v49 = vld [vmem:[#allocation2 + $0x129] sm:$0xff] }
  0x2c   :  { %131 = vst [vmem:[#allocation5 + $0x58] sm:$0xff] %v99_v51  ;;  %260 = vst [vmem:[#allocation5 + $0x158] sm:$0xff] %v227_v55  ;;  %v1336_v50 = vld [vmem:[#allocation2 + $0x110] sm:$0xff]  ;;  %v237_v51 = vsub.f32 %v1320_v41, %v1296_v25  ;;  %v487_v55 = vsub.f32 %v1243_v54, %v1267_v5 }
  0x2d   :  { %513 = vst [vmem:[#allocation5 + $0x330] sm:$0xff] %v480_v56  ;;  %132 = vst [vmem:[#allocation5 + $0x60] sm:$0xff] %v100_v57  ;;  %v110_v56 = vsub.f32 %v1324_v43, %v1332_v48  ;;  %v111_v57 = vsub.f32 %v1334_v49, %v1336_v50  ;;  %v1362_v5 = vld [vmem:[#allocation2 + $0x151] sm:$0xff] }
  0x2e   :  { %261 = vst [vmem:[#allocation5 + $0x160] sm:$0xff] %v228_v61  ;;  %262 = vst [vmem:[#allocation5 + $0x168] sm:$0xff] %v229_v62  ;;  %v1352_v61 = vld [vmem:[#allocation2 + $0x141] sm:$0xff]  ;;  %v239_v62 = vsub.f32 %v1334_v49, %v1320_v41 }
  0x2f   :  { %514 = vst [vmem:[#allocation5 + $0x338] sm:$0xff] %v481_v63  ;;  %133 = vst [vmem:[#allocation5 + $0x68] sm:$0xff] %v101_v0  ;;  %v488_v63 = vsub.f32 %v1252_v59, %v1276_v13  ;;  %v112_v0 = vsub.f32 %v1348_v58, %v1350_v60  ;;  %v489_v13 = vsub.f32 %v1265_v4, %v1280_v15 }
  0x30   :  { %134 = vst [vmem:[#allocation5 + $0x70] sm:$0xff] %v102_v2  ;;  %263 = vst [vmem:[#allocation5 + $0x170] sm:$0xff] %v230_v8  ;;  %v1360_v2 = vld [vmem:[#allocation2 + $0x128] sm:$0xff]  ;;  %v1364_v8 = vld [vmem:[#allocation2 + $0x138] sm:$0xff]  ;;  %v490_v15 = vsub.f32 %v1269_v7, %v1294_v23  ;;  %v491_v23 = vsub.f32 %v1278_v14, %v1304_v30  ;;  %v492_v30 = vsub.f32 %v1292_v22, %v1308_v33 }
  0x31   :  { %515 = vst [vmem:[#allocation5 + $0x340] sm:$0xff] %v482_v9  ;;  %135 = vst [vmem:[#allocation5 + $0x78] sm:$0xff] %v103_v11  ;;  %v240_v9 = vsub.f32 %v1348_v58, %v1324_v43  ;;  %v241_v11 = vsub.f32 %v1352_v61, %v1334_v49  ;;  %v493_v33 = vsub.f32 %v1296_v25, %v1322_v42 }
  0x32   :  { %264 = vst [vmem:[#allocation5 + $0x178] sm:$0xff] %v231_v16  ;;  %265 = vst [vmem:[#allocation5 + $0x180] sm:$0xff] %v232_v18  ;;  %v113_v16 = vsub.f32 %v1352_v61, %v1360_v2  ;;  %v114_v18 = vsub.f32 %v1362_v5, %v1364_v8 }
  0x33   :  { %516 = vst [vmem:[#allocation5 + $0x348] sm:$0xff] %v483_v19  ;;  %136 = vst [vmem:[#allocation5 + $0x80] sm:$0xff] %v104_v20  ;;  %v1376_v19 = vld [vmem:[#allocation2 + $0x159] sm:$0xff] }
  0x34   :  { %137 = vst [vmem:[#allocation5 + $0x88] sm:$0xff] %v105_v21  ;;  %266 = vst [vmem:[#allocation5 + $0x188] sm:$0xff] %v233_v27  ;;  %v1378_v20 = vld [vmem:[#allocation2 + $0x140] sm:$0xff]  ;;  %v1380_v21 = vld [vmem:[#allocation2 + $0x169] sm:$0xff]  ;;  %v242_v27 = vsub.f32 %v1362_v5, %v1348_v58 }
  0x35   :  { %517 = vst [vmem:[#allocation5 + $0x350] sm:$0xff] %v484_v28  ;;  %138 = vst [vmem:[#allocation5 + $0x90] sm:$0xff] %v106_v29  ;;  %v115_v28 = vsub.f32 %v1376_v19, %v1378_v20  ;;  %v1388_v29 = vld [vmem:[#allocation2 + $0x150] sm:$0xff] }
  0x36   :  { %267 = vst [vmem:[#allocation5 + $0x190] sm:$0xff] %v234_v34  ;;  %268 = vst [vmem:[#allocation5 + $0x198] sm:$0xff] %v235_v35  ;;  %v1390_v34 = vld [vmem:[#allocation2 + $0x171] sm:$0xff] }
  0x37   :  { %518 = vst [vmem:[#allocation5 + $0x358] sm:$0xff] %v485_v36  ;;  %139 = vst [vmem:[#allocation5 + $0x98] sm:$0xff] %v107_v37  ;;  %v1392_v35 = vld [vmem:[#allocation2 + $0x158] sm:$0xff]  ;;  %v243_v36 = vsub.f32 %v1376_v19, %v1352_v61  ;;  %v244_v37 = vsub.f32 %v1380_v21, %v1362_v5 }
  0x38   :  { %140 = vst [vmem:[#allocation5 + $0xa0] sm:$0xff] %v108_v39  ;;  %269 = vst [vmem:[#allocation5 + $0x1a0] sm:$0xff] %v236_v44  ;;  %v116_v39 = vsub.f32 %v1380_v21, %v1388_v29  ;;  %v117_v44 = vsub.f32 %v1390_v34, %v1392_v35 }
  0x39   :  { %519 = vst [vmem:[#allocation5 + $0x360] sm:$0xff] %v486_v46  ;;  %141 = vst [vmem:[#allocation5 + $0xa8] sm:$0xff] %v109_v47  ;;  %v1404_v46 = vld [vmem:[#allocation2 + $0x181] sm:$0xff] }
  0x3a   :  { %270 = vst [vmem:[#allocation5 + $0x1a8] sm:$0xff] %v237_v51  ;;  %271 = vst [vmem:[#allocation5 + $0x1b0] sm:$0xff] %v238_v53  ;;  %v1406_v47 = vld [vmem:[#allocation2 + $0x168] sm:$0xff]  ;;  %v245_v53 = vsub.f32 %v1390_v34, %v1376_v19 }
  0x3b   :  { %520 = vst [vmem:[#allocation5 + $0x368] sm:$0xff] %v487_v55  ;;  %142 = vst [vmem:[#allocation5 + $0xb0] sm:$0xff] %v110_v56  ;;  %v1408_v51 = vld [vmem:[#allocation2 + $0x189] sm:$0xff]  ;;  %v118_v55 = vsub.f32 %v1404_v46, %v1406_v47 }
  0x3c   :  { %143 = vst [vmem:[#allocation5 + $0xb8] sm:$0xff] %v111_v57  ;;  %272 = vst [vmem:[#allocation5 + $0x1b8] sm:$0xff] %v239_v62  ;;  %v1416_v56 = vld [vmem:[#allocation2 + $0x170] sm:$0xff]  ;;  %v184_v57 = vld [vmem:[#allocation2 + $0x1] sm:$0xff] }
  0x3d   :  { %521 = vst [vmem:[#allocation5 + $0x370] sm:$0xff] %v488_v63  ;;  %144 = vst [vmem:[#allocation5 + $0xc0] sm:$0xff] %v112_v0  ;;  %v185_v62 = vld [vmem:[#allocation2 + $0x9] sm:$0xff]  ;;  %v246_v63 = vsub.f32 %v1404_v46, %v1380_v21  ;;  %v247_v0 = vsub.f32 %v1408_v51, %v1390_v34 }
  0x3e   :  { %273 = vst [vmem:[#allocation5 + $0x1c0] sm:$0xff] %v240_v9  ;;  %274 = vst [vmem:[#allocation5 + $0x1c8] sm:$0xff] %v241_v11  ;;  %v119_v9 = vsub.f32 %v1408_v51, %v1416_v56  ;;  %v216_v11 = vsub.f32 %v1176_v1, %v184_v57  ;;  %v1466_v57 = vld [vmem:[#allocation2 + $0x7a] sm:$0xff] }
  0x3f   :  { %522 = vst [vmem:[#allocation5 + $0x378] sm:$0xff] %v489_v13  ;;  %145 = vst [vmem:[#allocation5 + $0xc8] sm:$0xff] %v113_v16  ;;  %v217_v13 = vsub.f32 %v1178_v3, %v185_v62  ;;  %v313_v16 = vld [vmem:[#allocation2 + $0x2] sm:$0xff] }
  0x40   :  { %146 = vst [vmem:[#allocation5 + $0xd0] sm:$0xff] %v114_v18  ;;  %275 = vst [vmem:[#allocation5 + $0x1d0] sm:$0xff] %v242_v27  ;;  %v314_v18 = vld [vmem:[#allocation2 + $0xa] sm:$0xff]  ;;  %v1428_v27 = vld [vmem:[#allocation2 + $0x1a] sm:$0xff]  ;;  %v345_v42 = vsub.f32 %v1176_v1, %v313_v16 }
  0x41   :  { %523 = vst [vmem:[#allocation5 + $0x380] sm:$0xff] %v490_v15  ;;  %147 = vst [vmem:[#allocation5 + $0xd8] sm:$0xff] %v115_v28  ;;  %v494_v15 = vsub.f32 %v1306_v32, %v1332_v48  ;;  %v346_v28 = vsub.f32 %v1178_v3, %v314_v18  ;;  %v495_v48 = vsub.f32 %v1320_v41, %v1336_v50  ;;  %v1468_v62 = vld [vmem:[#allocation2 + $0x82] sm:$0xff]  ;;  %v1506_v16 = vld [vmem:[#allocation2 + $0xda] sm:$0xff] }
  0x42   :  { %276 = vst [vmem:[#allocation5 + $0x1d8] sm:$0xff] %v243_v36  ;;  %277 = vst [vmem:[#allocation5 + $0x1e0] sm:$0xff] %v244_v37  ;;  %v347_v36 = vsub.f32 %v1181_v6, %v1428_v27  ;;  %v1436_v37 = vld [vmem:[#allocation2 + $0x22] sm:$0xff]  ;;  %v496_v50 = vsub.f32 %v1324_v43, %v1350_v60  ;;  %v497_v60 = vsub.f32 %v1334_v49, %v1360_v2 }
  0x43   :  { %524 = vst [vmem:[#allocation5 + $0x388] sm:$0xff] %v491_v23  ;;  %148 = vst [vmem:[#allocation5 + $0xe0] sm:$0xff] %v116_v39  ;;  %v1438_v23 = vld [vmem:[#allocation2 + $0x32] sm:$0xff]  ;;  %v1440_v39 = vld [vmem:[#allocation2 + $0x3a] sm:$0xff]  ;;  %v348_v1 = vsub.f32 %v1185_v10, %v1436_v37  ;;  %v498_v2 = vsub.f32 %v1348_v58, %v1364_v8  ;;  %v499_v8 = vsub.f32 %v1352_v61, %v1378_v20 }
  0x44   :  { %149 = vst [vmem:[#allocation5 + $0xe8] sm:$0xff] %v117_v44  ;;  %278 = vst [vmem:[#allocation5 + $0x1e8] sm:$0xff] %v245_v53  ;;  %v349_v3 = vsub.f32 %v1187_v12, %v1438_v23  ;;  %v350_v6 = vsub.f32 %v1193_v17, %v1440_v39  ;;  %v1450_v44 = vld [vmem:[#allocation2 + $0x4a] sm:$0xff]  ;;  %v1452_v53 = vld [vmem:[#allocation2 + $0x52] sm:$0xff]  ;;  %v500_v20 = vsub.f32 %v1362_v5, %v1388_v29 }
  0x45   :  { %525 = vst [vmem:[#allocation5 + $0x390] sm:$0xff] %v492_v30  ;;  %150 = vst [vmem:[#allocation5 + $0xf0] sm:$0xff] %v118_v55  ;;  %v1454_v30 = vld [vmem:[#allocation2 + $0x62] sm:$0xff]  ;;  %v351_v10 = vsub.f32 %v1202_v24, %v1450_v44  ;;  %v352_v12 = vsub.f32 %v1204_v26, %v1452_v53  ;;  %v1464_v55 = vld [vmem:[#allocation2 + $0x6a] sm:$0xff]  ;;  %v355_v26 = vsub.f32 %v1221_v40, %v1466_v57 }
  0x46   :  { %279 = vst [vmem:[#allocation5 + $0x1f0] sm:$0xff] %v246_v63  ;;  %280 = vst [vmem:[#allocation5 + $0x1f8] sm:$0xff] %v247_v0  ;;  %v353_v17 = vsub.f32 %v1210_v31, %v1454_v30  ;;  %v354_v24 = vsub.f32 %v1219_v38, %v1464_v55  ;;  %v356_v31 = vsub.f32 %v1227_v45, %v1468_v62  ;;  %v1478_v63 = vld [vmem:[#allocation2 + $0x92] sm:$0xff]  ;;  %v1480_v0 = vld [vmem:[#allocation2 + $0x9a] sm:$0xff] }
  0x47   :  { %526 = vst [vmem:[#allocation5 + $0x398] sm:$0xff] %v493_v33  ;;  %151 = vst [vmem:[#allocation5 + $0xf8] sm:$0xff] %v119_v9  ;;  %v1482_v33 = vld [vmem:[#allocation2 + $0xaa] sm:$0xff]  ;;  %v357_v38 = vsub.f32 %v1239_v52, %v1478_v63  ;;  %v358_v40 = vsub.f32 %v1243_v54, %v1480_v0  ;;  %v1492_v9 = vld [vmem:[#allocation2 + $0xb2] sm:$0xff]  ;;  %v501_v29 = vsub.f32 %v1376_v19, %v1392_v35 }
  0x48   :  { %249 = vst [vmem:[#allocation5 + $0x100] sm:$0xff] %v216_v11  ;;  %250 = vst [vmem:[#allocation5 + $0x108] sm:$0xff] %v217_v13  ;;  %v359_v45 = vsub.f32 %v1252_v59, %v1482_v33  ;;  %v1494_v11 = vld [vmem:[#allocation2 + $0xc2] sm:$0xff]  ;;  %v1496_v13 = vld [vmem:[#allocation2 + $0xca] sm:$0xff]  ;;  %v360_v52 = vsub.f32 %v1265_v4, %v1492_v9  ;;  %v363_v4 = vsub.f32 %v1292_v22, %v1506_v16 }
  0x49   :  { %527 = vst [vmem:[#allocation5 + $0x3a0] sm:$0xff] %v494_v15  ;;  %378 = vst [vmem:[#allocation5 + $0x200] sm:$0xff] %v345_v42  ;;  %v361_v54 = vsub.f32 %v1269_v7, %v1494_v11  ;;  %v362_v59 = vsub.f32 %v1278_v14, %v1496_v13  ;;  %v1508_v18 = vld [vmem:[#allocation2 + $0xe2] sm:$0xff]  ;;  %v1510_v15 = vld [vmem:[#allocation2 + $0xf2] sm:$0xff]  ;;  %v502_v35 = vsub.f32 %v1380_v21, %v1406_v47 }
  0x4a   :  { %379 = vst [vmem:[#allocation5 + $0x208] sm:$0xff] %v346_v28  ;;  %380 = vst [vmem:[#allocation5 + $0x210] sm:$0xff] %v347_v36  ;;  %v364_v7 = vsub.f32 %v1296_v25, %v1508_v18  ;;  %v365_v14 = vsub.f32 %v1306_v32, %v1510_v15  ;;  %v1520_v42 = vld [vmem:[#allocation2 + $0xfa] sm:$0xff]  ;;  %v1522_v28 = vld [vmem:[#allocation2 + $0x10a] sm:$0xff]  ;;  %v503_v47 = vsub.f32 %v1390_v34, %v1416_v56 }
  0x4b   :  { %528 = vst [vmem:[#allocation5 + $0x3a8] sm:$0xff] %v495_v48  ;;  %381 = vst [vmem:[#allocation5 + $0x218] sm:$0xff] %v348_v1  ;;  %v1524_v36 = vld [vmem:[#allocation2 + $0x112] sm:$0xff]  ;;  %v366_v22 = vsub.f32 %v1320_v41, %v1520_v42  ;;  %v367_v25 = vsub.f32 %v1324_v43, %v1522_v28  ;;  %v1534_v48 = vld [vmem:[#allocation2 + $0x122] sm:$0xff] }
  0x4c   :  { %382 = vst [vmem:[#allocation5 + $0x220] sm:$0xff] %v349_v3  ;;  %383 = vst [vmem:[#allocation5 + $0x228] sm:$0xff] %v350_v6  ;;  %v368_v32 = vsub.f32 %v1334_v49, %v1524_v36  ;;  %v1536_v1 = vld [vmem:[#allocation2 + $0x12a] sm:$0xff]  ;;  %v1538_v3 = vld [vmem:[#allocation2 + $0x13a] sm:$0xff]  ;;  %v369_v41 = vsub.f32 %v1348_v58, %v1534_v48 }
  0x4d   :  { %529 = vst [vmem:[#allocation5 + $0x3b0] sm:$0xff] %v496_v50  ;;  %384 = vst [vmem:[#allocation5 + $0x230] sm:$0xff] %v351_v10  ;;  %v370_v43 = vsub.f32 %v1352_v61, %v1536_v1  ;;  %v371_v49 = vsub.f32 %v1362_v5, %v1538_v3  ;;  %v1548_v6 = vld [vmem:[#allocation2 + $0x142] sm:$0xff]  ;;  %v1550_v50 = vld [vmem:[#allocation2 + $0x152] sm:$0xff] }
  0x4e   :  { %385 = vst [vmem:[#allocation5 + $0x238] sm:$0xff] %v352_v12  ;;  %386 = vst [vmem:[#allocation5 + $0x240] sm:$0xff] %v353_v17  ;;  %v1552_v10 = vld [vmem:[#allocation2 + $0x15a] sm:$0xff]  ;;  %v372_v58 = vsub.f32 %v1376_v19, %v1548_v6  ;;  %v373_v61 = vsub.f32 %v1380_v21, %v1550_v50  ;;  %v1562_v12 = vld [vmem:[#allocation2 + $0x16a] sm:$0xff] }
  0x4f   :  { %530 = vst [vmem:[#allocation5 + $0x3b8] sm:$0xff] %v497_v60  ;;  %387 = vst [vmem:[#allocation5 + $0x248] sm:$0xff] %v354_v24  ;;  %v374_v5 = vsub.f32 %v1390_v34, %v1552_v10  ;;  %v1564_v17 = vld [vmem:[#allocation2 + $0x172] sm:$0xff]  ;;  %v1566_v60 = vld [vmem:[#allocation2 + $0x180] sm:$0xff]  ;;  %v375_v56 = vsub.f32 %v1404_v46, %v1562_v12 }
  0x50   :  { %388 = vst [vmem:[#allocation5 + $0x250] sm:$0xff] %v355_v26  ;;  %389 = vst [vmem:[#allocation5 + $0x258] sm:$0xff] %v356_v31  ;;  %v376_v19 = vsub.f32 %v1408_v51, %v1564_v17  ;;  %v504_v21 = vsub.f32 %v1404_v46, %v1566_v60  ;;  %v1574_v34 = vld [vmem:[#allocation2 + $0x188] sm:$0xff]  ;;  %v1576_v24 = vld [vmem:[#allocation2 + $0x19] sm:$0xff] }
  0x51   :  { %531 = vst [vmem:[#allocation5 + $0x3c0] sm:$0xff] %v498_v2  ;;  %390 = vst [vmem:[#allocation5 + $0x260] sm:$0xff] %v357_v38  ;;  %v1578_v26 = vld [vmem:[#allocation2 + $0x21] sm:$0xff]  ;;  %v505_v31 = vsub.f32 %v1408_v51, %v1574_v34  ;;  %v636_v2 = vsub.f32 %v1576_v24, %v1428_v27  ;;  %v1588_v46 = vld [vmem:[#allocation2 + $0x39] sm:$0xff] }
  0x52   :  { %391 = vst [vmem:[#allocation5 + $0x268] sm:$0xff] %v358_v40  ;;  %392 = vst [vmem:[#allocation5 + $0x270] sm:$0xff] %v359_v45  ;;  %v637_v38 = vsub.f32 %v1578_v26, %v1436_v37  ;;  %v1586_v40 = vld [vmem:[#allocation2 + $0x31] sm:$0xff]  ;;  %v1590_v45 = vld [vmem:[#allocation2 + $0x49] sm:$0xff]  ;;  %v639_v51 = vsub.f32 %v1588_v46, %v1440_v39 }
  0x53   :  { %532 = vst [vmem:[#allocation5 + $0x3c8] sm:$0xff] %v499_v8  ;;  %393 = vst [vmem:[#allocation5 + $0x278] sm:$0xff] %v360_v52  ;;  %v638_v8 = vsub.f32 %v1586_v40, %v1438_v23  ;;  %v640_v27 = vsub.f32 %v1590_v45, %v1450_v44  ;;  %v1598_v52 = vld [vmem:[#allocation2 + $0x51] sm:$0xff]  ;;  %v1600_v37 = vld [vmem:[#allocation2 + $0x61] sm:$0xff] }
  0x54   :  { %394 = vst [vmem:[#allocation5 + $0x280] sm:$0xff] %v361_v54  ;;  %395 = vst [vmem:[#allocation5 + $0x288] sm:$0xff] %v362_v59  ;;  %v1602_v54 = vld [vmem:[#allocation2 + $0x69] sm:$0xff]  ;;  %v895_v59 = vsub.f32 %v1576_v24, %v1586_v40  ;;  %v641_v23 = vsub.f32 %v1598_v52, %v1452_v53  ;;  %v642_v39 = vsub.f32 %v1600_v37, %v1454_v30 }
  0x55   :  { %533 = vst [vmem:[#allocation5 + $0x3d0] sm:$0xff] %v500_v20  ;;  %396 = vst [vmem:[#allocation5 + $0x290] sm:$0xff] %v363_v4  ;;  %v643_v44 = vsub.f32 %v1602_v54, %v1464_v55  ;;  %v1612_v20 = vld [vmem:[#allocation2 + $0x79] sm:$0xff]  ;;  %v1614_v4 = vld [vmem:[#allocation2 + $0x81] sm:$0xff] }
  0x56   :  { %397 = vst [vmem:[#allocation5 + $0x298] sm:$0xff] %v364_v7  ;;  %398 = vst [vmem:[#allocation5 + $0x2a0] sm:$0xff] %v365_v14  ;;  %v1616_v7 = vld [vmem:[#allocation2 + $0x91] sm:$0xff]  ;;  %v896_v14 = vsub.f32 %v1578_v26, %v1588_v46  ;;  %v644_v53 = vsub.f32 %v1612_v20, %v1466_v57  ;;  %v645_v30 = vsub.f32 %v1614_v4, %v1468_v62 }
  0x57   :  { %534 = vst [vmem:[#allocation5 + $0x3d8] sm:$0xff] %v501_v29  ;;  %399 = vst [vmem:[#allocation5 + $0x2a8] sm:$0xff] %v366_v22  ;;  %v646_v55 = vsub.f32 %v1616_v7, %v1478_v63  ;;  %v1626_v29 = vld [vmem:[#allocation2 + $0x99] sm:$0xff]  ;;  %v1628_v22 = vld [vmem:[#allocation2 + $0xa9] sm:$0xff] }
  0x58   :  { %400 = vst [vmem:[#allocation5 + $0x2b0] sm:$0xff] %v367_v25  ;;  %401 = vst [vmem:[#allocation5 + $0x2b8] sm:$0xff] %v368_v32  ;;  %v1630_v25 = vld [vmem:[#allocation2 + $0xb1] sm:$0xff]  ;;  %v897_v32 = vsub.f32 %v1586_v40, %v1590_v45  ;;  %v647_v57 = vsub.f32 %v1626_v29, %v1480_v0  ;;  %v648_v62 = vsub.f32 %v1628_v22, %v1482_v33 }
  0x59   :  { %535 = vst [vmem:[#allocation5 + $0x3e0] sm:$0xff] %v502_v35  ;;  %402 = vst [vmem:[#allocation5 + $0x2c0] sm:$0xff] %v369_v41  ;;  %v649_v63 = vsub.f32 %v1630_v25, %v1492_v9  ;;  %v1640_v35 = vld [vmem:[#allocation2 + $0xc1] sm:$0xff]  ;;  %v1642_v41 = vld [vmem:[#allocation2 + $0xc9] sm:$0xff] }
  0x5a   :  { %403 = vst [vmem:[#allocation5 + $0x2c8] sm:$0xff] %v370_v43  ;;  %404 = vst [vmem:[#allocation5 + $0x2d0] sm:$0xff] %v371_v49  ;;  %v1644_v43 = vld [vmem:[#allocation2 + $0xd9] sm:$0xff]  ;;  %v898_v49 = vsub.f32 %v1588_v46, %v1598_v52  ;;  %v650_v0 = vsub.f32 %v1640_v35, %v1494_v11  ;;  %v651_v33 = vsub.f32 %v1642_v41, %v1496_v13 }
  0x5b   :  { %536 = vst [vmem:[#allocation5 + $0x3e8] sm:$0xff] %v503_v47  ;;  %405 = vst [vmem:[#allocation5 + $0x2d8] sm:$0xff] %v372_v58  ;;  %v652_v9 = vsub.f32 %v1644_v43, %v1506_v16  ;;  %v1654_v47 = vld [vmem:[#allocation2 + $0xe1] sm:$0xff]  ;;  %v1656_v58 = vld [vmem:[#allocation2 + $0xf1] sm:$0xff] }
  0x5c   :  { %406 = vst [vmem:[#allocation5 + $0x2e0] sm:$0xff] %v373_v61  ;;  %407 = vst [vmem:[#allocation5 + $0x2e8] sm:$0xff] %v374_v5  ;;  %v1658_v61 = vld [vmem:[#allocation2 + $0xf9] sm:$0xff]  ;;  %v899_v5 = vsub.f32 %v1590_v45, %v1600_v37  ;;  %v653_v11 = vsub.f32 %v1654_v47, %v1508_v18  ;;  %v654_v13 = vsub.f32 %v1656_v58, %v1510_v15 }
  0x5d   :  { %408 = vst [vmem:[#allocation5 + $0x2f0] sm:$0xff] %v375_v56  ;;  %409 = vst [vmem:[#allocation5 + $0x2f8] sm:$0xff] %v376_v19  ;;  %v655_v16 = vsub.f32 %v1658_v61, %v1520_v42  ;;  %v1668_v56 = vld [vmem:[#allocation2 + $0x109] sm:$0xff]  ;;  %v1670_v19 = vld [vmem:[#allocation2 + $0x111] sm:$0xff] }
  0x5e   :  { %537 = vst [vmem:[#allocation5 + $0x3f0] sm:$0xff] %v504_v21  ;;  %538 = vst [vmem:[#allocation5 + $0x3f8] sm:$0xff] %v505_v31  ;;  %v1672_v21 = vld [vmem:[#allocation2 + $0x121] sm:$0xff]  ;;  %v900_v31 = vsub.f32 %v1598_v52, %v1602_v54  ;;  %v656_v18 = vsub.f32 %v1668_v56, %v1522_v28  ;;  %v657_v15 = vsub.f32 %v1670_v19, %v1524_v36 }
  0x5f   :  { %669 = vst [vmem:[#allocation5 + $0x500] sm:$0xff] %v636_v2  ;;  %670 = vst [vmem:[#allocation5 + $0x508] sm:$0xff] %v637_v38  ;;  %v658_v42 = vsub.f32 %v1672_v21, %v1534_v48  ;;  %v1682_v2 = vld [vmem:[#allocation2 + $0x129] sm:$0xff]  ;;  %v1684_v38 = vld [vmem:[#allocation2 + $0x139] sm:$0xff] }
  0x60   :  { %671 = vst [vmem:[#allocation5 + $0x510] sm:$0xff] %v638_v8  ;;  %672 = vst [vmem:[#allocation5 + $0x518] sm:$0xff] %v639_v51  ;;  %v1686_v8 = vld [vmem:[#allocation2 + $0x141] sm:$0xff]  ;;  %v901_v51 = vsub.f32 %v1600_v37, %v1612_v20  ;;  %v659_v28 = vsub.f32 %v1682_v2, %v1536_v1  ;;  %v660_v36 = vsub.f32 %v1684_v38, %v1538_v3 }
  0x61   :  { %673 = vst [vmem:[#allocation5 + $0x520] sm:$0xff] %v640_v27  ;;  %928 = vst [vmem:[#allocation5 + $0x700] sm:$0xff] %v895_v59  ;;  %v661_v48 = vsub.f32 %v1686_v8, %v1548_v6  ;;  %v1696_v27 = vld [vmem:[#allocation2 + $0x151] sm:$0xff]  ;;  %v1698_v59 = vld [vmem:[#allocation2 + $0x159] sm:$0xff] }
  0x62   :  { %674 = vst [vmem:[#allocation5 + $0x528] sm:$0xff] %v641_v23  ;;  %675 = vst [vmem:[#allocation5 + $0x530] sm:$0xff] %v642_v39  ;;  %v1700_v23 = vld [vmem:[#allocation2 + $0x169] sm:$0xff]  ;;  %v902_v39 = vsub.f32 %v1602_v54, %v1614_v4  ;;  %v662_v1 = vsub.f32 %v1696_v27, %v1550_v50  ;;  %v663_v3 = vsub.f32 %v1698_v59, %v1552_v10 }
  0x63   :  { %676 = vst [vmem:[#allocation5 + $0x538] sm:$0xff] %v643_v44  ;;  %929 = vst [vmem:[#allocation5 + $0x708] sm:$0xff] %v896_v14  ;;  %v664_v6 = vsub.f32 %v1700_v23, %v1562_v12  ;;  %v1710_v44 = vld [vmem:[#allocation2 + $0x171] sm:$0xff]  ;;  %v1712_v14 = vld [vmem:[#allocation2 + $0x181] sm:$0xff] }
  0x64   :  { %677 = vst [vmem:[#allocation5 + $0x540] sm:$0xff] %v644_v53  ;;  %678 = vst [vmem:[#allocation5 + $0x548] sm:$0xff] %v645_v30  ;;  %v1714_v53 = vld [vmem:[#allocation2 + $0x182] sm:$0xff]  ;;  %v794_v30 = vsub.f32 %v1700_v23, %v1566_v60  ;;  %v665_v50 = vsub.f32 %v1710_v44, %v1564_v17  ;;  %v903_v60 = vsub.f32 %v1612_v20, %v1616_v7 }
  0x65   :  { %679 = vst [vmem:[#allocation5 + $0x550] sm:$0xff] %v646_v55  ;;  %930 = vst [vmem:[#allocation5 + $0x710] sm:$0xff] %v897_v32  ;;  %v666_v10 = vsub.f32 %v1712_v14, %v1714_v53  ;;  %v1722_v12 = vld [vmem:[#allocation2 + $0x189] sm:$0xff] }
  0x66   :  { %680 = vst [vmem:[#allocation5 + $0x558] sm:$0xff] %v647_v57  ;;  %681 = vst [vmem:[#allocation5 + $0x560] sm:$0xff] %v648_v62  ;;  %v1724_v55 = vld [vmem:[#allocation2 + $0x18a] sm:$0xff]  ;;  %v795_v57 = vsub.f32 %v1710_v44, %v1574_v34  ;;  %v905_v34 = vsub.f32 %v1616_v7, %v1628_v22 }
  0x67   :  { %682 = vst [vmem:[#allocation5 + $0x568] sm:$0xff] %v649_v63  ;;  %931 = vst [vmem:[#allocation5 + $0x718] sm:$0xff] %v898_v49  ;;  %v734_v32 = vld [vmem:[#allocation2 + $0x30] sm:$0xff]  ;;  %v667_v17 = vsub.f32 %v1722_v12, %v1724_v55  ;;  %v735_v63 = vld [vmem:[#allocation2 + $0x38] sm:$0xff] }
  0x68   :  { %683 = vst [vmem:[#allocation5 + $0x570] sm:$0xff] %v650_v0  ;;  %684 = vst [vmem:[#allocation5 + $0x578] sm:$0xff] %v651_v33  ;;  %v766_v62 = vsub.f32 %v1576_v24, %v734_v32  ;;  %v736_v49 = vld [vmem:[#allocation2 + $0x48] sm:$0xff]  ;;  %v737_v0 = vld [vmem:[#allocation2 + $0x50] sm:$0xff]  ;;  %v904_v33 = vsub.f32 %v1614_v4, %v1626_v29  ;;  %v908_v32 = vsub.f32 %v1630_v25, %v1642_v41 }
  0x69   :  { %685 = vst [vmem:[#allocation5 + $0x580] sm:$0xff] %v652_v9  ;;  %932 = vst [vmem:[#allocation5 + $0x720] sm:$0xff] %v899_v5  ;;  %v767_v9 = vsub.f32 %v1578_v26, %v735_v63  ;;  %v768_v5 = vsub.f32 %v1586_v40, %v736_v49  ;;  %v748_v63 = vld [vmem:[#allocation2 + $0xd8] sm:$0xff]  ;;  %v749_v49 = vld [vmem:[#allocation2 + $0xe0] sm:$0xff] }
  0x6a   :  { %686 = vst [vmem:[#allocation5 + $0x588] sm:$0xff] %v653_v11  ;;  %687 = vst [vmem:[#allocation5 + $0x590] sm:$0xff] %v654_v13  ;;  %v769_v11 = vsub.f32 %v1588_v46, %v737_v0  ;;  %v738_v13 = vld [vmem:[#allocation2 + $0x60] sm:$0xff]  ;;  %v909_v0 = vsub.f32 %v1640_v35, %v1644_v43 }
  0x6b   :  { %688 = vst [vmem:[#allocation5 + $0x598] sm:$0xff] %v655_v16  ;;  %933 = vst [vmem:[#allocation5 + $0x728] sm:$0xff] %v900_v31  ;;  %v739_v16 = vld [vmem:[#allocation2 + $0x68] sm:$0xff]  ;;  %v740_v31 = vld [vmem:[#allocation2 + $0x78] sm:$0xff] }
  0x6c   :  { %689 = vst [vmem:[#allocation5 + $0x5a0] sm:$0xff] %v656_v18  ;;  %690 = vst [vmem:[#allocation5 + $0x5a8] sm:$0xff] %v657_v15  ;;  %v906_v18 = vsub.f32 %v1626_v29, %v1630_v25  ;;  %v770_v15 = vsub.f32 %v1590_v45, %v738_v13  ;;  %v752_v13 = vld [vmem:[#allocation2 + $0x108] sm:$0xff] }
  0x6d   :  { %691 = vst [vmem:[#allocation5 + $0x5b0] sm:$0xff] %v658_v42  ;;  %934 = vst [vmem:[#allocation5 + $0x730] sm:$0xff] %v901_v51  ;;  %v771_v42 = vsub.f32 %v1598_v52, %v739_v16  ;;  %v772_v51 = vsub.f32 %v1600_v37, %v740_v31  ;;  %v910_v16 = vsub.f32 %v1642_v41, %v1654_v47 }
  0x6e   :  { %692 = vst [vmem:[#allocation5 + $0x5b8] sm:$0xff] %v659_v28  ;;  %693 = vst [vmem:[#allocation5 + $0x5c0] sm:$0xff] %v660_v36  ;;  %v741_v28 = vld [vmem:[#allocation2 + $0x80] sm:$0xff]  ;;  %v742_v36 = vld [vmem:[#allocation2 + $0x90] sm:$0xff] }
  0x6f   :  { %694 = vst [vmem:[#allocation5 + $0x5c8] sm:$0xff] %v661_v48  ;;  %935 = vst [vmem:[#allocation5 + $0x738] sm:$0xff] %v902_v39  ;;  %v743_v48 = vld [vmem:[#allocation2 + $0x98] sm:$0xff]  ;;  %v907_v39 = vsub.f32 %v1628_v22, %v1640_v35 }
  0x70   :  { %695 = vst [vmem:[#allocation5 + $0x5d0] sm:$0xff] %v662_v1  ;;  %696 = vst [vmem:[#allocation5 + $0x5d8] sm:$0xff] %v663_v3  ;;  %v773_v1 = vsub.f32 %v1602_v54, %v741_v28  ;;  %v774_v3 = vsub.f32 %v1612_v20, %v742_v36  ;;  %v755_v28 = vld [vmem:[#allocation2 + $0x128] sm:$0xff]  ;;  %v911_v36 = vsub.f32 %v1644_v43, %v1656_v58 }
  0x71   :  { %697 = vst [vmem:[#allocation5 + $0x5e0] sm:$0xff] %v664_v6  ;;  %827 = vst [vmem:[#allocation5 + $0x6e0] sm:$0xff] %v794_v30  ;;  %v775_v6 = vsub.f32 %v1614_v4, %v743_v48  ;;  %v744_v30 = vld [vmem:[#allocation2 + $0xa8] sm:$0xff] }
  0x72   :  { %698 = vst [vmem:[#allocation5 + $0x5e8] sm:$0xff] %v665_v50  ;;  %699 = vst [vmem:[#allocation5 + $0x5f0] sm:$0xff] %v666_v10  ;;  %v745_v50 = vld [vmem:[#allocation2 + $0xb0] sm:$0xff]  ;;  %v746_v10 = vld [vmem:[#allocation2 + $0xc0] sm:$0xff] }
  0x73   :  { %828 = vst [vmem:[#allocation5 + $0x6e8] sm:$0xff] %v795_v57  ;;  %936 = vst [vmem:[#allocation5 + $0x740] sm:$0xff] %v903_v60  ;;  %v776_v57 = vsub.f32 %v1616_v7, %v744_v30  ;;  %v777_v60 = vsub.f32 %v1626_v29, %v745_v50  ;;  %v758_v30 = vld [vmem:[#allocation2 + $0x150] sm:$0xff]  ;;  %v912_v50 = vsub.f32 %v1654_v47, %v1658_v61 }
  0x74   :  { %700 = vst [vmem:[#allocation5 + $0x5f8] sm:$0xff] %v667_v17  ;;  %799 = vst [vmem:[#allocation5 + $0x600] sm:$0xff] %v766_v62  ;;  %v778_v17 = vsub.f32 %v1628_v22, %v746_v10  ;;  %v747_v62 = vld [vmem:[#allocation2 + $0xc8] sm:$0xff] }
  0x75   :  { %937 = vst [vmem:[#allocation5 + $0x748] sm:$0xff] %v904_v33  ;;  %938 = vst [vmem:[#allocation5 + $0x750] sm:$0xff] %v905_v34  ;;  %v779_v33 = vsub.f32 %v1630_v25, %v747_v62  ;;  %v780_v34 = vsub.f32 %v1640_v35, %v748_v63  ;;  %v761_v62 = vld [vmem:[#allocation2 + $0x170] sm:$0xff]  ;;  %v913_v63 = vsub.f32 %v1656_v58, %v1668_v56 }
  0x76   :  { %800 = vst [vmem:[#allocation5 + $0x608] sm:$0xff] %v767_v9  ;;  %801 = vst [vmem:[#allocation5 + $0x610] sm:$0xff] %v768_v5  ;;  %v781_v9 = vsub.f32 %v1642_v41, %v749_v49  ;;  %v750_v5 = vld [vmem:[#allocation2 + $0xf0] sm:$0xff] }
  0x77   :  { %802 = vst [vmem:[#allocation5 + $0x618] sm:$0xff] %v769_v11  ;;  %939 = vst [vmem:[#allocation5 + $0x758] sm:$0xff] %v906_v18  ;;  %v751_v11 = vld [vmem:[#allocation2 + $0xf8] sm:$0xff]  ;;  %v782_v31 = vsub.f32 %v1644_v43, %v750_v5  ;;  %v914_v5 = vsub.f32 %v1658_v61, %v1670_v19 }
  0x78   :  { %803 = vst [vmem:[#allocation5 + $0x620] sm:$0xff] %v770_v15  ;;  %804 = vst [vmem:[#allocation5 + $0x628] sm:$0xff] %v771_v42  ;;  %v783_v18 = vsub.f32 %v1654_v47, %v751_v11  ;;  %v784_v15 = vsub.f32 %v1656_v58, %v752_v13  ;;  %v753_v42 = vld [vmem:[#allocation2 + $0x110] sm:$0xff]  ;;  %v893_v11 = vld [vmem:[#allocation2 + $0x199] sm:$0xff] }
  0x79   :  { %805 = vst [vmem:[#allocation5 + $0x630] sm:$0xff] %v772_v51  ;;  %940 = vst [vmem:[#allocation5 + $0x760] sm:$0xff] %v907_v39  ;;  %v754_v51 = vld [vmem:[#allocation2 + $0x120] sm:$0xff]  ;;  %v785_v48 = vsub.f32 %v1658_v61, %v753_v42  ;;  %v992_v42 = vld [vmem:[#allocation2 + $0x32] sm:$0xff] }
  0x7a   :  { %806 = vst [vmem:[#allocation5 + $0x638] sm:$0xff] %v773_v1  ;;  %807 = vst [vmem:[#allocation5 + $0x640] sm:$0xff] %v774_v3  ;;  %v786_v39 = vsub.f32 %v1668_v56, %v754_v51  ;;  %v787_v1 = vsub.f32 %v1670_v19, %v755_v28  ;;  %v756_v3 = vld [vmem:[#allocation2 + $0x138] sm:$0xff]  ;;  %v917_v28 = vsub.f32 %v1672_v21, %v1684_v38 }
  0x7b   :  { %808 = vst [vmem:[#allocation5 + $0x648] sm:$0xff] %v775_v6  ;;  %941 = vst [vmem:[#allocation5 + $0x768] sm:$0xff] %v908_v32  ;;  %v757_v6 = vld [vmem:[#allocation2 + $0x140] sm:$0xff]  ;;  %v788_v10 = vsub.f32 %v1672_v21, %v756_v3  ;;  %v995_v3 = vld [vmem:[#allocation2 + $0x52] sm:$0xff] }
  0x7c   :  { %809 = vst [vmem:[#allocation5 + $0x650] sm:$0xff] %v776_v57  ;;  %810 = vst [vmem:[#allocation5 + $0x658] sm:$0xff] %v777_v60  ;;  %v789_v32 = vsub.f32 %v1682_v2, %v757_v6  ;;  %v790_v57 = vsub.f32 %v1684_v38, %v758_v30  ;;  %v759_v60 = vld [vmem:[#allocation2 + $0x158] sm:$0xff]  ;;  %v996_v6 = vld [vmem:[#allocation2 + $0x62] sm:$0xff]  ;;  %v921_v30 = vsub.f32 %v1696_v27, %v1700_v23 }
  0x7d   :  { %811 = vst [vmem:[#allocation5 + $0x660] sm:$0xff] %v778_v17  ;;  %942 = vst [vmem:[#allocation5 + $0x770] sm:$0xff] %v909_v0  ;;  %v760_v17 = vld [vmem:[#allocation2 + $0x168] sm:$0xff]  ;;  %v791_v49 = vsub.f32 %v1686_v8, %v759_v60  ;;  %v993_v51 = vld [vmem:[#allocation2 + $0x3a] sm:$0xff] }
  0x7e   :  { %812 = vst [vmem:[#allocation5 + $0x668] sm:$0xff] %v779_v33  ;;  %813 = vst [vmem:[#allocation5 + $0x670] sm:$0xff] %v780_v34  ;;  %v792_v0 = vsub.f32 %v1696_v27, %v760_v17  ;;  %v793_v33 = vsub.f32 %v1698_v59, %v761_v62  ;;  %v764_v34 = vld [vmem:[#allocation2 + $0x198] sm:$0xff]  ;;  %v999_v17 = vld [vmem:[#allocation2 + $0x82] sm:$0xff]  ;;  %v925_v62 = vsub.f32 %v1712_v14, %v893_v11 }
  0x7f   :  { %814 = vst [vmem:[#allocation5 + $0x678] sm:$0xff] %v781_v9  ;;  %943 = vst [vmem:[#allocation5 + $0x778] sm:$0xff] %v910_v16  ;;  %v765_v9 = vld [vmem:[#allocation2 + $0x1a0] sm:$0xff]  ;;  %v796_v13 = vsub.f32 %v1712_v14, %v764_v34 }
  0x80   :  { %815 = vst [vmem:[#allocation5 + $0x680] sm:$0xff] %v782_v31  ;;  %816 = vst [vmem:[#allocation5 + $0x688] sm:$0xff] %v783_v18  ;;  %v797_v16 = vsub.f32 %v1722_v12, %v765_v9  ;;  %v915_v31 = vsub.f32 %v1668_v56, %v1672_v21  ;;  %v916_v18 = vsub.f32 %v1670_v19, %v1682_v2  ;;  %v998_v60 = vld [vmem:[#allocation2 + $0x7a] sm:$0xff]  ;;  %v1002_v9 = vld [vmem:[#allocation2 + $0xaa] sm:$0xff] }
  0x81   :  { %817 = vst [vmem:[#allocation5 + $0x690] sm:$0xff] %v784_v15  ;;  %944 = vst [vmem:[#allocation5 + $0x780] sm:$0xff] %v911_v36  ;;  %v894_v15 = vld [vmem:[#allocation2 + $0x1a1] sm:$0xff]  ;;  %v918_v36 = vsub.f32 %v1682_v2, %v1686_v8 }
  0x82   :  { %818 = vst [vmem:[#allocation5 + $0x698] sm:$0xff] %v785_v48  ;;  %819 = vst [vmem:[#allocation5 + $0x6a0] sm:$0xff] %v786_v39  ;;  %v919_v48 = vsub.f32 %v1684_v38, %v1696_v27  ;;  %v920_v39 = vsub.f32 %v1686_v8, %v1698_v59  ;;  %v1001_v34 = vld [vmem:[#allocation2 + $0x9a] sm:$0xff] }
  0x83   :  { %820 = vst [vmem:[#allocation5 + $0x6a8] sm:$0xff] %v787_v1  ;;  %945 = vst [vmem:[#allocation5 + $0x788] sm:$0xff] %v912_v50  ;;  %v994_v1 = vld [vmem:[#allocation2 + $0x4a] sm:$0xff]  ;;  %v922_v50 = vsub.f32 %v1698_v59, %v1710_v44 }
  0x84   :  { %821 = vst [vmem:[#allocation5 + $0x6b0] sm:$0xff] %v788_v10  ;;  %822 = vst [vmem:[#allocation5 + $0x6b8] sm:$0xff] %v789_v32  ;;  %v923_v10 = vsub.f32 %v1700_v23, %v1712_v14  ;;  %v924_v32 = vsub.f32 %v1710_v44, %v1722_v12 }
  0x85   :  { %823 = vst [vmem:[#allocation5 + $0x6c0] sm:$0xff] %v790_v57  ;;  %946 = vst [vmem:[#allocation5 + $0x790] sm:$0xff] %v913_v63  ;;  %v997_v57 = vld [vmem:[#allocation2 + $0x6a] sm:$0xff]  ;;  %v926_v63 = vsub.f32 %v1722_v12, %v894_v15  ;;  %v1031_v15 = vsub.f32 %v1602_v54, %v999_v17  ;;  %v1009_v54 = vld [vmem:[#allocation2 + $0xfa] sm:$0xff] }
  0x86   :  { %824 = vst [vmem:[#allocation5 + $0x6c8] sm:$0xff] %v791_v49  ;;  %825 = vst [vmem:[#allocation5 + $0x6d0] sm:$0xff] %v792_v0  ;;  %v1024_v49 = vsub.f32 %v1576_v24, %v992_v42  ;;  %v1025_v0 = vsub.f32 %v1578_v26, %v993_v51  ;;  %v1029_v11 = vsub.f32 %v1598_v52, %v997_v57  ;;  %v1005_v24 = vld [vmem:[#allocation2 + $0xca] sm:$0xff]  ;;  %v1007_v51 = vld [vmem:[#allocation2 + $0xe2] sm:$0xff] }
  0x87   :  { %826 = vst [vmem:[#allocation5 + $0x6d8] sm:$0xff] %v793_v33  ;;  %947 = vst [vmem:[#allocation5 + $0x798] sm:$0xff] %v914_v5  ;;  %v1000_v33 = vld [vmem:[#allocation2 + $0x92] sm:$0xff]  ;;  %v1026_v5 = vsub.f32 %v1586_v40, %v994_v1  ;;  %v1030_v26 = vsub.f32 %v1600_v37, %v998_v60  ;;  %v1033_v40 = vsub.f32 %v1614_v4, %v1001_v34 }
  0x88   :  { %829 = vst [vmem:[#allocation5 + $0x6f0] sm:$0xff] %v796_v13  ;;  %830 = vst [vmem:[#allocation5 + $0x6f8] sm:$0xff] %v797_v16  ;;  %v1027_v13 = vsub.f32 %v1588_v46, %v995_v3  ;;  %v1028_v16 = vsub.f32 %v1590_v45, %v996_v6  ;;  %v1032_v42 = vsub.f32 %v1612_v20, %v1000_v33  ;;  %v1006_v46 = vld [vmem:[#allocation2 + $0xda] sm:$0xff]  ;;  %v1008_v45 = vld [vmem:[#allocation2 + $0xf2] sm:$0xff] }
  0x89   :  { %948 = vst [vmem:[#allocation5 + $0x7a0] sm:$0xff] %v915_v31  ;;  %949 = vst [vmem:[#allocation5 + $0x7a8] sm:$0xff] %v916_v18  ;;  %v1003_v31 = vld [vmem:[#allocation2 + $0xb2] sm:$0xff]  ;;  %v1004_v18 = vld [vmem:[#allocation2 + $0xc2] sm:$0xff]  ;;  %v1034_v52 = vsub.f32 %v1616_v7, %v1002_v9  ;;  %v1037_v37 = vsub.f32 %v1630_v25, %v1005_v24  ;;  %v1038_v4 = vsub.f32 %v1640_v35, %v1006_v46 }
  0x8a   :  { %950 = vst [vmem:[#allocation5 + $0x7b0] sm:$0xff] %v917_v28  ;;  %951 = vst [vmem:[#allocation5 + $0x7b8] sm:$0xff] %v918_v36  ;;  %v1035_v28 = vsub.f32 %v1626_v29, %v1003_v31  ;;  %v1036_v36 = vsub.f32 %v1628_v22, %v1004_v18  ;;  %v1011_v20 = vld [vmem:[#allocation2 + $0x112] sm:$0xff]  ;;  %v1040_v1 = vsub.f32 %v1644_v43, %v1008_v45  ;;  %v1012_v29 = vld [vmem:[#allocation2 + $0x122] sm:$0xff] }
  0x8b   :  { %952 = vst [vmem:[#allocation5 + $0x7c0] sm:$0xff] %v919_v48  ;;  %953 = vst [vmem:[#allocation5 + $0x7c8] sm:$0xff] %v920_v39  ;;  %v1010_v48 = vld [vmem:[#allocation2 + $0x10a] sm:$0xff]  ;;  %v1039_v39 = vsub.f32 %v1642_v41, %v1007_v51  ;;  %v1041_v7 = vsub.f32 %v1654_v47, %v1009_v54  ;;  %v1014_v22 = vld [vmem:[#allocation2 + $0x13a] sm:$0xff]  ;;  %v1043_v6 = vsub.f32 %v1658_v61, %v1011_v20 }
  0x8c   :  { %954 = vst [vmem:[#allocation5 + $0x7d0] sm:$0xff] %v921_v30  ;;  %955 = vst [vmem:[#allocation5 + $0x7d8] sm:$0xff] %v922_v50  ;;  %v1013_v3 = vld [vmem:[#allocation2 + $0x12a] sm:$0xff]  ;;  %v1042_v25 = vsub.f32 %v1656_v58, %v1010_v48  ;;  %v1044_v30 = vsub.f32 %v1668_v56, %v1012_v29  ;;  %v1015_v41 = vld [vmem:[#allocation2 + $0x142] sm:$0xff]  ;;  %v1046_v47 = vsub.f32 %v1672_v21, %v1014_v22 }
  0x8d   :  { %956 = vst [vmem:[#allocation5 + $0x7e0] sm:$0xff] %v923_v10  ;;  %957 = vst [vmem:[#allocation5 + $0x7e8] sm:$0xff] %v924_v32  ;;  %v1045_v35 = vsub.f32 %v1670_v19, %v1013_v3  ;;  %v1016_v50 = vld [vmem:[#allocation2 + $0x152] sm:$0xff]  ;;  %v1017_v43 = vld [vmem:[#allocation2 + $0x15a] sm:$0xff]  ;;  %v1047_v10 = vsub.f32 %v1682_v2, %v1015_v41  ;;  %v1052_v21 = vsub.f32 %v1700_v23, %v1714_v53 }
  0x8e   :  { %958 = vst [vmem:[#allocation5 + $0x7f0] sm:$0xff] %v925_v62  ;;  %959 = vst [vmem:[#allocation5 + $0x7f8] sm:$0xff] %v926_v63  ;;  %v1048_v58 = vsub.f32 %v1684_v38, %v1016_v50  ;;  %v1049_v61 = vsub.f32 %v1686_v8, %v1017_v43  ;;  %v1018_v56 = vld [vmem:[#allocation2 + $0x16a] sm:$0xff]  ;;  %v1019_v32 = vld [vmem:[#allocation2 + $0x172] sm:$0xff]  ;;  %v1053_v2 = vsub.f32 %v1710_v44, %v1724_v55 }
  0x8f   :  { %1057 = vst [vmem:[#allocation5 + $0x800] sm:$0xff] %v1024_v49  ;;  %1058 = vst [vmem:[#allocation5 + $0x808] sm:$0xff] %v1025_v0  ;;  %v1022_v19 = vld [vmem:[#allocation2 + $0x19a] sm:$0xff]  ;;  %v1050_v57 = vsub.f32 %v1696_v27, %v1018_v56  ;;  %v1051_v60 = vsub.f32 %v1698_v59, %v1019_v32  ;;  %v1023_v38 = vld [vmem:[#allocation2 + $0x1a2] sm:$0xff] }
  0x90   :  { %1059 = vst [vmem:[#allocation5 + $0x810] sm:$0xff] %v1026_v5  ;;  %1060 = vst [vmem:[#allocation5 + $0x818] sm:$0xff] %v1027_v13  ;;  %v1054_v8 = vsub.f32 %v1712_v14, %v1022_v19  ;;  %v1055_v17 = vsub.f32 %v1722_v12, %v1023_v38 }
  0x91   :  { %1061 = vst [vmem:[#allocation5 + $0x820] sm:$0xff] %v1028_v16  ;;  %1062 = vst [vmem:[#allocation5 + $0x828] sm:$0xff] %v1029_v11 }
  0x92   :  { %1063 = vst [vmem:[#allocation5 + $0x830] sm:$0xff] %v1030_v26  ;;  %1064 = vst [vmem:[#allocation5 + $0x838] sm:$0xff] %v1031_v15 }
  0x93   :  { %1065 = vst [vmem:[#allocation5 + $0x840] sm:$0xff] %v1032_v42  ;;  %1066 = vst [vmem:[#allocation5 + $0x848] sm:$0xff] %v1033_v40 }
  0x94   :  { %1067 = vst [vmem:[#allocation5 + $0x850] sm:$0xff] %v1034_v52  ;;  %1068 = vst [vmem:[#allocation5 + $0x858] sm:$0xff] %v1035_v28 }
  0x95   :  { %1069 = vst [vmem:[#allocation5 + $0x860] sm:$0xff] %v1036_v36  ;;  %1070 = vst [vmem:[#allocation5 + $0x868] sm:$0xff] %v1037_v37 }
  0x96   :  { %1071 = vst [vmem:[#allocation5 + $0x870] sm:$0xff] %v1038_v4  ;;  %1072 = vst [vmem:[#allocation5 + $0x878] sm:$0xff] %v1039_v39 }
  0x97   :  { %1073 = vst [vmem:[#allocation5 + $0x880] sm:$0xff] %v1040_v1  ;;  %1074 = vst [vmem:[#allocation5 + $0x888] sm:$0xff] %v1041_v7 }
  0x98   :  { %1075 = vst [vmem:[#allocation5 + $0x890] sm:$0xff] %v1042_v25  ;;  %1076 = vst [vmem:[#allocation5 + $0x898] sm:$0xff] %v1043_v6 }
  0x99   :  { %1077 = vst [vmem:[#allocation5 + $0x8a0] sm:$0xff] %v1044_v30  ;;  %1078 = vst [vmem:[#allocation5 + $0x8a8] sm:$0xff] %v1045_v35 }
  0x9a   :  { %1079 = vst [vmem:[#allocation5 + $0x8b0] sm:$0xff] %v1046_v47  ;;  %1080 = vst [vmem:[#allocation5 + $0x8b8] sm:$0xff] %v1047_v10 }
  0x9b   :  { %1081 = vst [vmem:[#allocation5 + $0x8c0] sm:$0xff] %v1048_v58  ;;  %1082 = vst [vmem:[#allocation5 + $0x8c8] sm:$0xff] %v1049_v61 }
  0x9c   :  { %1083 = vst [vmem:[#allocation5 + $0x8d0] sm:$0xff] %v1050_v57  ;;  %1084 = vst [vmem:[#allocation5 + $0x8d8] sm:$0xff] %v1051_v60 }
  0x9d   :  { %1085 = vst [vmem:[#allocation5 + $0x8e0] sm:$0xff] %v1052_v21  ;;  %1086 = vst [vmem:[#allocation5 + $0x8e8] sm:$0xff] %v1053_v2 }
  0x9e   :  { %1087 = vst [vmem:[#allocation5 + $0x8f0] sm:$0xff] %v1054_v8  ;;  %1088 = vst [vmem:[#allocation5 + $0x8f8] sm:$0xff] %v1055_v17 }
  0x9f   :  { %1142 = shalt.err (!%p1139_p9)
}
  0xa0   :  { %1100 = dma.vmem_to_hbm [thread:$0]  %s1095_s13, 36864, %s1847_s1, [#allocation4], %s1156_s9, %s1156_s9, %s1157_s10  }
  0xa1   :  { %1153 = dma.done.wait [#allocation4], 36864  }
  0xa2   :  { %1154 = vsyncadd [#allocation4], 4294930432 }
  0xa3   :  { %1104 = vsyncpa [#allocation3], 1 }
  0xa4   :  { %1105 = vsyncpa [#allocation4], 1 }

</bundles_post_ra>
